<compile_context>
chip_gen: v6e
topology: v6e:2x2x1
jax: 0.10.0
libtpu: 0.0.40
codegen_flags: <defaults>
</compile_context>

<pallas_src>
import functools

import jax
import jax.numpy as jnp
from jax.experimental import pallas as pl
from jax.experimental.pallas import tpu as pltpu

_LANES = 128
_SUBLANES = 8


def _round_up(n, m):
    return ((n + m - 1) // m) * m


def _fused_mlp_kernel(x_ref, w_ref, b_ref, o_ref):
    # Single fused matmul: (TILE_B, K) @ (K, N) with f32 accumulation on the MXU.
    y = jnp.dot(x_ref[...], w_ref[...], preferred_element_type=jnp.float32)
    y = y + b_ref[...]            # (1, N) bias row broadcasts over the batch tile
    o_ref[...] = jnp.maximum(y, 0.0).astype(o_ref.dtype)


def mlp_forward(x, w1, b1, w2, b2, *, compute_dtype=jnp.bfloat16, tile_b=256):
    """Forward of MLP: relu(fc2(fc1(x))).

    x:  (B, in)      w1: (in, hid)   b1: (hid,)
    w2: (hid, out)   b2: (out,)
    (PyTorch nn.Linear stores weight as (out, in); transpose once when
     exporting parameters — pure glue, done at construction time below.)
    """
    out_dtype = x.dtype
    B, K = x.shape
    N = w2.shape[1]

    # --- Fuse the two affine layers (exact in f32): y = x @ W + b,  W = W1 @ W2.
    w = jnp.dot(w1.astype(jnp.float32), w2.astype(jnp.float32))
    b = (jnp.dot(b1.astype(jnp.float32)[None, :], w2.astype(jnp.float32))
         + b2.astype(jnp.float32)[None, :])

    # --- Pad features to lane multiples, batch to the batch tile.
    k_p = _round_up(K, _LANES)
    n_p = _round_up(N, _LANES)
    tile_b = min(tile_b, _round_up(B, _SUBLANES))
    b_rows_p = _round_up(B, tile_b)

    x_p = jnp.zeros((b_rows_p, k_p), compute_dtype).at[:B, :K].set(
        x.astype(compute_dtype))
    w_p = jnp.zeros((k_p, n_p), compute_dtype).at[:K, :N].set(
        w.astype(compute_dtype))
    bias_p = jnp.zeros((1, n_p), jnp.float32).at[:, :N].set(b)

    grid = (b_rows_p // tile_b,)
    itemsize = jnp.dtype(compute_dtype).itemsize
    cost = pl.CostEstimate(
        flops=2 * b_rows_p * k_p * n_p,
        transcendentals=0,
        bytes_accessed=(x_p.size + w_p.size) * itemsize
        + bias_p.size * 4
        + b_rows_p * n_p * jnp.dtype(out_dtype).itemsize,
    )

    out = pl.pallas_call(
        _fused_mlp_kernel,
        out_shape=jax.ShapeDtypeStruct((b_rows_p, n_p), out_dtype),
        grid_spec=pltpu.PrefetchScalarGridSpec(
            num_scalar_prefetch=0,
            grid=grid,
            in_specs=[
                pl.BlockSpec((tile_b, k_p), lambda i: (i, 0)),   # stream x tiles
                pl.BlockSpec((k_p, n_p), lambda i: (0, 0)),      # W resident in VMEM
                pl.BlockSpec((1, n_p), lambda i: (0, 0)),        # bias resident
            ],
            out_specs=pl.BlockSpec((tile_b, n_p), lambda i: (i, 0)),
        ),
        compiler_params=pltpu.CompilerParams(
            dimension_semantics=("parallel",),   # v7x megacore; no-op on v5e/v6e
        ),
        cost_estimate=cost,
    )(x_p, w_p, bias_p)

    return out[:B, :N]


def _reference(x, w1, b1, w2, b2):
    h = x @ w1 + b1
    return jnp.maximum(h @ w2 + b2, 0.0)


if __name__ == "__main__":
    key = jax.random.PRNGKey(0)
    k_x, k_w1, k_b1, k_w2, k_b2 = jax.random.split(key, 5)

    batch, in_size, hid_sizes, out_size = 8, 32, 64, 16

    x = jax.random.normal(k_x, (batch, in_size), dtype=jnp.float32)

    # Deterministic parameter init (PyTorch-Linear-like uniform scale).
    bound1 = 1.0 / (in_size ** 0.5)
    bound2 = 1.0 / (hid_sizes ** 0.5)
    # nn.Linear stores weight as (out, in); we build (in, out) directly (= W.T).
    w1 = jax.random.uniform(k_w1, (in_size, hid_sizes), minval=-bound1, maxval=bound1)
    b1 = jax.random.uniform(k_b1, (hid_sizes,), minval=-bound1, maxval=bound1)
    w2 = jax.random.uniform(k_w2, (hid_sizes, out_size), minval=-bound2, maxval=bound2)
    b2 = jax.random.uniform(k_b2, (out_size,), minval=-bound2, maxval=bound2)

    ref = _reference(x, w1, b1, w2, b2)

    # fp32-compute path: exact forward semantics, tight tolerance.
    fwd_f32 = jax.jit(functools.partial(mlp_forward, compute_dtype=jnp.float32))
    out_f32 = jax.block_until_ready(fwd_f32(x, w1, b1, w2, b2))
    assert out_f32.shape == (batch, out_size)
    assert jnp.allclose(out_f32, ref, atol=1e-4, rtol=1e-4)

    # bf16-compute path (default, MXU-native) with f32 accumulation: loose tolerance.
    fwd_bf16 = jax.jit(functools.partial(mlp_forward, compute_dtype=jnp.bfloat16))
    out_bf16 = jax.block_until_ready(fwd_bf16(x, w1, b1, w2, b2))
    assert out_bf16.shape == (batch, out_size)
    assert jnp.allclose(out_bf16, ref, atol=5e-2, rtol=5e-2)

    print("KERNEL_OK")
</pallas_src>

<mosaic_0001>
module attributes {stable_mosaic.version = 11 : i64} {
  func.func @_fused_mlp_kernel(%arg0: i32, %arg1: memref<8x128xf32, #tpu.memory_space<vmem>>, %arg2: memref<128x128xf32, #tpu.memory_space<vmem>>, %arg3: memref<1x128xf32, #tpu.memory_space<vmem>>, %arg4: memref<8x128xf32, #tpu.memory_space<vmem>>) attributes {dimension_semantics = [#tpu.dimension_semantics<parallel>], iteration_bounds = array<i64: 1>, scalar_prefetch = 0 : i64, scratch_operands = 0 : i64, tpu.core_type = #tpu.core_type<tc>, window_params = [{transform_indices = @transform_0, window_bounds = array<i64: 8, 128>}, {pipeline_mode = #tpu.pipeline_mode<synchronous>, transform_indices = @transform_1, window_bounds = array<i64: 128, 128>}, {pipeline_mode = #tpu.pipeline_mode<synchronous>, transform_indices = @transform_2, window_bounds = array<i64: 1, 128>}, {transform_indices = @transform_3, window_bounds = array<i64: 8, 128>}]} {
    %c0 = arith.constant 0 : index
    %c0_0 = arith.constant 0 : index
    %0 = vector.load %arg1[%c0, %c0_0] : memref<8x128xf32, #tpu.memory_space<vmem>>, vector<8x128xf32>
    %c0_1 = arith.constant 0 : index
    %c0_2 = arith.constant 0 : index
    %1 = vector.load %arg2[%c0_1, %c0_2] : memref<128x128xf32, #tpu.memory_space<vmem>>, vector<128x128xf32>
    %cst = arith.constant dense<0.000000e+00> : vector<8x128xf32>
    %2 = tpu.matmul %0, %1, %cst {dimension_numbers = #tpu.dot_dimension_numbers<[1], [0], [0], [1], [0, 0, 1, 1], [], []>} : vector<8x128xf32>, vector<128x128xf32>, vector<8x128xf32> -> vector<8x128xf32>
    %c0_3 = arith.constant 0 : index
    %c0_4 = arith.constant 0 : index
    %3 = vector.load %arg3[%c0_3, %c0_4] : memref<1x128xf32, #tpu.memory_space<vmem>>, vector<1x128xf32>
    %4 = vector.broadcast %3 : vector<1x128xf32> to vector<8x128xf32>
    %5 = arith.addf %2, %4 : vector<8x128xf32>
    %cst_5 = arith.constant 0.000000e+00 : f32
    %6 = vector.broadcast %cst_5 : f32 to vector<8x128xf32>
    %7 = arith.maximumf %5, %6 : vector<8x128xf32>
    %c0_6 = arith.constant 0 : index
    %c0_7 = arith.constant 0 : index
    %8 = vector.load %arg4[%c0_6, %c0_7] : memref<8x128xf32, #tpu.memory_space<vmem>>, vector<8x128xf32>
    tpu.vector_store %arg4[%c0_6, %c0_7], %7 {strides = array<i32>} : memref<8x128xf32, #tpu.memory_space<vmem>>, vector<8x128xf32>,
    return
  }
  func.func @transform_0(%arg0: i32) -> (i32, i32) {
    %c0_i32 = arith.constant 0 : i32
    %c0_i32_0 = arith.constant 0 : i32
    return %arg0, %c0_i32 : i32, i32
  }
  func.func @transform_1(%arg0: i32) -> (i32, i32) {
    %c0_i32 = arith.constant 0 : i32
    %c0_i32_0 = arith.constant 0 : i32
    %c0_i32_1 = arith.constant 0 : i32
    return %c0_i32, %c0_i32_0 : i32, i32
  }
  func.func @transform_2(%arg0: i32) -> (i32, i32) {
    %c0_i32 = arith.constant 0 : i32
    %c0_i32_0 = arith.constant 0 : i32
    %c0_i32_1 = arith.constant 0 : i32
    return %c0_i32, %c0_i32_0 : i32, i32
  }
  func.func @transform_3(%arg0: i32) -> (i32, i32) {
    %c0_i32 = arith.constant 0 : i32
    %c0_i32_0 = arith.constant 0 : i32
    return %arg0, %c0_i32 : i32, i32
  }
}

</mosaic_0001>

<bundles_post_ra>
// kernel: mlp_forward.1
= control target key start
LH: loop header
LB: loop body
LE: loop exit
PB: predicated region body
PF: predicated region fallthrough
CT: control target
= control target key end

     0   :  { %v203_v1 = vmov 0.0   ;;  %vm204_vm0 = vmmov 0   ;;  %s283_s0 = inlined_call_operand.vmem [shape: f32[8,128], index: 0, kind: input, shape index: {}]   ;;  %s284_s1 = inlined_call_operand.vmem [shape: f32[128,128], index: 1, kind: input, shape index: {}]   ;;  %s285_s2 = inlined_call_operand.vmem [shape: f32[1,128], index: 2, kind: input, shape index: {}]   ;;  %s286_s3 = inlined_call_operand.hbm [shape: f32[8,128], index: 3, kind: output, shape index: {}]  }
   0x1   :  { %v31_v0 = vld [vmem:[%s284_s1 + $0x78] sm:$0xff]  ;;  %143 = vmatprep.subr.mxu0 %v203_v1  ;;  %v30_v2 = vld [vmem:[%s284_s1 + $0x70] sm:$0xff]  ;;  %175 = vmatprep.mubr.msk.f32.mxu0 %vm204_vm0, %v203_v1  ;;  %v29_v3 = vld [vmem:[%s284_s1 + $0x68] sm:$0xff] }
   0x2   :  { %144 = vmatpush3.msra.mxu0 %v31_v0  ;;  %v28_v4 = vld [vmem:[%s284_s1 + $0x60] sm:$0xff] }
   0x3   :  { %145 = vmatprep.subr.mxu0 %v203_v1 }
   0x4   :  { %146 = vmatpush3.msra.mxu0 %v30_v2 }
   0x5   :  { %147 = vmatprep.subr.mxu0 %v203_v1 }
   0x6   :  { %148 = vmatpush3.msra.mxu0 %v29_v3 }
   0x7   :  { %8 = vsyncpa [#allocation3], 0  ;;  %149 = vmatprep.subr.mxu0 %v203_v1  ;;  %v27_v5 = vld [vmem:[%s284_s1 + $0x58] sm:$0xff]  ;;  %v26_v6 = vld [vmem:[%s284_s1 + $0x50] sm:$0xff]  ;;  %s205_s21 = smov [#allocation2]  }
   0x8   :  { %150 = vmatpush3.msra.mxu0 %v28_v4  ;;  %v25_v7 = vld [vmem:[%s284_s1 + $0x48] sm:$0xff]  ;;  %v24_v8 = vld [vmem:[%s284_s1 + $0x40] sm:$0xff]  ;;  %v23_v9 = vld [vmem:[%s284_s1 + $0x38] sm:$0xff]  ;;  %s117_s22 = sshll.u32 %s205_s21, 4  ;;  %s118_s22 = int_to_ptr.vmem [resolvable:$true] %s117_s22 }
   0x9   :  { %151 = vmatprep.subr.mxu0 %v203_v1  ;;  %v22_v10 = vld [vmem:[%s284_s1 + $0x30] sm:$0xff]  ;;  %v21_v11 = vld [vmem:[%s284_s1 + $0x28] sm:$0xff]  ;;  %v20_v12 = vld [vmem:[%s284_s1 + $0x20] sm:$0xff]  ;;  %p186_p1 = scmp.lt.s32.totalorder %s118_s22, %s118_s22 }
   0xa   :  { %152 = vmatpush3.msra.mxu0 %v27_v5  ;;  %v19_v13 = vld [vmem:[%s284_s1 + $0x18] sm:$0xff]  ;;  %v18_v14 = vld [vmem:[%s284_s1 + $0x10] sm:$0xff]  ;;  %v17_v15 = vld [vmem:[%s284_s1 + $0x8] sm:$0xff] }
   0xb   :  { %153 = vmatprep.subr.mxu0 %v203_v1  ;;  %v16_v16 = vld [vmem:[%s284_s1] sm:$0xff]  ;;  %s181_s1 = scalar_lea.vmem %s118_s22, 128 }
   0xc   :  { %154 = vmatpush3.msra.mxu0 %v26_v6  ;;  %v15_v17 = vld [vmem:[%s283_s0] sm:$0xff]  ;;  %p182_p0 = scmp.ne.s32.totalorder %s118_s22, %s181_s1  ;;  %p187_p2 = scmp.lt.s32.totalorder %s181_s1, %s181_s1 }
   0xd   :  { %155 = vmatprep.subr.mxu0 %v203_v1  ;;  %v125_v18 = vld [vmem:[%s285_s2] ss:$0 sm:$0xff] }
   0xe   :  { %156 = vmatpush3.msra.mxu0 %v25_v7  ;;  %p188_p3 = por %p187_p2, %p186_p1 }
   0xf   :  { %157 = vmatprep.subr.mxu0 %v203_v1 }
  0x10   :  { %158 = vmatpush3.msra.mxu0 %v24_v8  ;;  %p189_p4 = pnand %p188_p3, %p182_p0 }
  0x11   :  { %159 = vmatprep.subr.mxu0 %v203_v1 }
  0x12   :  { %160 = vmatpush3.msra.mxu0 %v23_v9 }
  0x13   :  { %161 = vmatprep.subr.mxu0 %v203_v1 }
  0x14   :  { %162 = vmatpush3.msra.mxu0 %v22_v10 }
  0x15   :  { %163 = vmatprep.subr.mxu0 %v203_v1 }
  0x16   :  { %164 = vmatpush3.msra.mxu0 %v21_v11 }
  0x17   :  { %165 = vmatprep.subr.mxu0 %v203_v1 }
  0x18   :  { %166 = vmatpush3.msra.mxu0 %v20_v12 }
  0x19   :  { %167 = vmatprep.subr.mxu0 %v203_v1 }
  0x1a   :  { %168 = vmatpush3.msra.mxu0 %v19_v13 }
  0x1b   :  { %169 = vmatprep.subr.mxu0 %v203_v1 }
  0x1c   :  { %170 = vmatpush3.msra.mxu0 %v18_v14 }
  0x1d   :  { %171 = vmatprep.subr.mxu0 %v203_v1 }
  0x1e   :  { %172 = vmatpush3.msra.mxu0 %v17_v15 }
  0x1f   :  { %173 = vmatprep.subr.mxu0 %v203_v1 }
  0x20   :  { %174 = vmatpush3.msra.mxu0 %v16_v16 }
  0x21   :  { %176 = vmatmul.mubr.f32.vlgmr.msra.gmra.mxu0 %v15_v17 }
  0xe1   :  { %v105_v19 = vpop.f32.mrf.mxu0 }
  0xe2   :  { %v106_v20 = vadd.f32 %v125_v18, %v105_v19 }
  0xe3   :  { %v177_v21 = vpop.f32.mrf.mxu0 }
  0xe4   :  { %v109_v22 = vmax.f32 %v106_v20, 0.0 }
  0xe6   :  { %110 = vst [vmem:[#allocation2] sm:$0xff] %v109_v22 }
  0xe7   :  { %192 = shalt.err (!%p189_p4)
}
  0xe8   :  { %120 = dma.vmem_to_hbm [thread:$0]  %s118_s22, 128, %s286_s3, [#allocation3]  }
  0xe9   :  { %201 = dma.done.wait [#allocation3], 128  }
  0xea   :  { %202 = vsyncadd [#allocation3], 4294967168 }
  0xeb   :  { %124 = vsyncpa [#allocation3], 1 }

</bundles_post_ra>
